<compile_context>
chip_gen: v6e
topology: v6e:2x2x1
jax: 0.10.0
libtpu: 0.0.40
codegen_flags: <defaults>
</compile_context>

<pallas_src>
import functools

import jax
import jax.numpy as jnp
from jax.experimental import pallas as pl
from jax.experimental.pallas import tpu as pltpu


# ---------------------------------------------------------------------------
# Pass 1: tiled global average pool (sum over HW tiles, * 1/HW at finalize)
# ---------------------------------------------------------------------------
def _pool_kernel(x_ref, y_ref, *, inv_hw):
    # x_ref: (1, C, T) input tile; y_ref: (1, C, 1) f32 accumulator
    # (output block index is constant along the HW grid axis -> VMEM resident).
    t = pl.program_id(1)

    @pl.when(t == 0)
    def _():
        y_ref[...] = jnp.zeros_like(y_ref)

    # cross-lane reduce per tile (XLU), accumulate in f32 regardless of x dtype
    y_ref[...] += jnp.sum(x_ref[...], axis=-1, keepdims=True, dtype=jnp.float32)

    @pl.when(t == pl.num_programs(1) - 1)
    def _():
        y_ref[...] = y_ref[...] * inv_hw


# ---------------------------------------------------------------------------
# Squeeze-excite MLP, batched over N (one small matmul pair, full-block kernel)
# ---------------------------------------------------------------------------
def _mlp_kernel(y_ref, w1_ref, b1_ref, w2_ref, b2_ref, s_ref):
    # y_ref: (N, C) f32; w1_ref: (C, C//2); b1_ref: (1, C//2);
    # w2_ref: (C//2, C); b2_ref: (1, C); s_ref: (N, C) in x dtype.
    y = y_ref[...]
    h = jnp.dot(y, w1_ref[...], preferred_element_type=jnp.float32) + b1_ref[...]
    h = jnp.maximum(h, 0.0)
    s = jnp.dot(h, w2_ref[...], preferred_element_type=jnp.float32) + b2_ref[...]
    s_ref[...] = jax.nn.sigmoid(s).astype(s_ref.dtype)


# ---------------------------------------------------------------------------
# Pass 2: tiled broadcast multiply (kept in input dtype, lane-dense stores)
# ---------------------------------------------------------------------------
def _scale_kernel(x_ref, s_ref, o_ref):
    # x_ref: (1, C, T); s_ref: (1, C, 1) in x dtype; o_ref: (1, C, T)
    o_ref[...] = x_ref[...] * s_ref[...]


def _pick_spatial_tile(C, HW, dtype_bytes, target_bytes=2 * 1024 * 1024):
    """Largest multiple-of-128 spatial tile keeping one (C, T) block <= target."""
    lanes = (target_bytes // max(1, C * dtype_bytes)) // 128 * 128
    lanes = max(128, int(lanes))
    hw_lane_pad = pl.cdiv(HW, 128) * 128
    return int(min(lanes, hw_lane_pad))


def ca_layer(x, w1, b1, w2, b2):
    """x: (N, C, H, W) NCHW; w1: (C//2, C); b1: (C//2,); w2: (C, C//2); b2: (C,)."""
    N, C, H, W = x.shape
    HW = H * W
    Ch = w1.shape[0]

    dtype_bytes = jnp.dtype(x.dtype).itemsize
    T = _pick_spatial_tile(C, HW, dtype_bytes)
    HW_pad = pl.cdiv(HW, T) * T
    n_t = HW_pad // T

    x3 = x.reshape(N, C, HW)
    if HW_pad != HW:
        x3 = jnp.pad(x3, ((0, 0), (0, 0), (0, HW_pad - HW)))

    # ---- pass 1: per-(N, C) global mean, tiled over HW -----------------------
    pooled = pl.pallas_call(
        functools.partial(_pool_kernel, inv_hw=1.0 / HW),
        out_shape=jax.ShapeDtypeStruct((N, C, 1), jnp.float32),
        grid_spec=pltpu.PrefetchScalarGridSpec(
            num_scalar_prefetch=0,
            grid=(N, n_t),
            in_specs=[pl.BlockSpec((1, C, T), lambda n, t: (n, 0, t))],
            out_specs=pl.BlockSpec((1, C, 1), lambda n, t: (n, 0, 0)),
        ),
        compiler_params=pltpu.CompilerParams(
            dimension_semantics=("parallel", "arbitrary")),
    )(x3)

    # ---- batched squeeze-excite MLP over all N images ------------------------
    w1t = jnp.transpose(w1).astype(jnp.float32)    # (C, C//2)
    w2t = jnp.transpose(w2).astype(jnp.float32)    # (C//2, C)
    b1r = b1.reshape(1, Ch).astype(jnp.float32)
    b2r = b2.reshape(1, C).astype(jnp.float32)
    y2 = pooled.reshape(N, C)

    s2 = pl.pallas_call(
        _mlp_kernel,
        out_shape=jax.ShapeDtypeStruct((N, C), x.dtype),
    )(y2, w1t, b1r, w2t, b2r)

    s3 = s2.reshape(N, C, 1)                       # per-image channel scales

    # ---- pass 2: tiled broadcast multiply ------------------------------------
    out3 = pl.pallas_call(
        _scale_kernel,
        out_shape=jax.ShapeDtypeStruct((N, C, HW_pad), x.dtype),
        grid_spec=pltpu.PrefetchScalarGridSpec(
            num_scalar_prefetch=0,
            grid=(N, n_t),
            in_specs=[
                pl.BlockSpec((1, C, T), lambda n, t: (n, 0, t)),
                pl.BlockSpec((1, C, 1), lambda n, t: (n, 0, 0)),
            ],
            out_specs=pl.BlockSpec((1, C, T), lambda n, t: (n, 0, t)),
        ),
        compiler_params=pltpu.CompilerParams(
            dimension_semantics=("parallel", "parallel")),
    )(x3, s3)

    return out3[:, :, :HW].reshape(N, C, H, W)


def _reference(x, w1, b1, w2, b2):
    # pure-JAX reference for sanity checking
    y = jnp.mean(x, axis=(2, 3))                            # (N, C)
    h = jnp.maximum(y @ w1.T + b1, 0.0)                     # (N, C//2)
    s = jax.nn.sigmoid(h @ w2.T + b2)                       # (N, C)
    return x * s[:, :, None, None]


if __name__ == "__main__":
    key = jax.random.PRNGKey(0)
    k_x, k_w1, k_b1, k_w2, k_b2 = jax.random.split(key, 5)

    N, C, H, W = 2, 4, 16, 16
    Ch = C // 2

    x = jax.random.normal(k_x, (N, C, H, W), dtype=jnp.float32)
    # deterministic synthetic parameters (Conv2d 1x1 weights squeezed to 2-D)
    w1 = jax.random.normal(k_w1, (Ch, C), dtype=jnp.float32) * 0.5
    b1 = jax.random.normal(k_b1, (Ch,), dtype=jnp.float32) * 0.1
    w2 = jax.random.normal(k_w2, (C, Ch), dtype=jnp.float32) * 0.5
    b2 = jax.random.normal(k_b2, (C,), dtype=jnp.float32) * 0.1

    out = ca_layer(x, w1, b1, w2, b2)
    out = jax.block_until_ready(out)

    ref = _reference(x, w1, b1, w2, b2)
    assert out.shape == (N, C, H, W)
    assert jnp.allclose(out, ref, atol=1e-5, rtol=1e-5)

    print("KERNEL_OK")
</pallas_src>

<mosaic_0001>
module attributes {stable_mosaic.version = 11 : i64} {
  func.func @_pool_kernel(%arg0: i32, %arg1: i32, %arg2: memref<1x4x256xf32, #tpu.memory_space<vmem>>, %arg3: memref<1x4x1xf32, #tpu.memory_space<vmem>>) attributes {dimension_semantics = [#tpu.dimension_semantics<parallel>, #tpu.dimension_semantics<arbitrary>], iteration_bounds = array<i64: 2, 1>, scalar_prefetch = 0 : i64, scratch_operands = 0 : i64, tpu.core_type = #tpu.core_type<tc>, window_params = [{transform_indices = @transform_0, window_bounds = array<i64: 1, 4, 256>}, {transform_indices = @transform_1, window_bounds = array<i64: 1, 4, 1>}]} {
    %c0_i32 = arith.constant 0 : i32
    %0 = arith.cmpi eq, %arg1, %c0_i32 : i32
    %1 = arith.extui %0 : i1 to i32
    %c0_i32_0 = arith.constant 0 : i32
    %2 = arith.cmpi ne, %1, %c0_i32_0 : i32
    scf.if %2 {
      %cst_11 = arith.constant 0.000000e+00 : f32
      %12 = vector.broadcast %cst_11 : f32 to vector<1x4x1xf32>
      %c0_12 = arith.constant 0 : index
      %c0_13 = arith.constant 0 : index
      %c0_14 = arith.constant 0 : index
      %13 = vector.load %arg3[%c0_12, %c0_13, %c0_14] : memref<1x4x1xf32, #tpu.memory_space<vmem>>, vector<1x4x1xf32>
      tpu.vector_store %arg3[%c0_12, %c0_13, %c0_14], %12 {strides = array<i32>} : memref<1x4x1xf32, #tpu.memory_space<vmem>>, vector<1x4x1xf32>,
    } else {
    }
    %c0 = arith.constant 0 : index
    %c0_1 = arith.constant 0 : index
    %c0_2 = arith.constant 0 : index
    %3 = vector.load %arg3[%c0, %c0_1, %c0_2] : memref<1x4x1xf32, #tpu.memory_space<vmem>>, vector<1x4x1xf32>
    %c0_3 = arith.constant 0 : index
    %c0_4 = arith.constant 0 : index
    %c0_5 = arith.constant 0 : index
    %4 = vector.load %arg2[%c0_3, %c0_4, %c0_5] : memref<1x4x256xf32, #tpu.memory_space<vmem>>, vector<1x4x256xf32>
    %cst = arith.constant dense<0.000000e+00> : vector<1x4xf32>
    %5 = vector.multi_reduction <add>, %4, %cst [2] : vector<1x4x256xf32> to vector<1x4xf32>
    %6 = vector.shape_cast %5 : vector<1x4xf32> to vector<1x4x1xf32>
    %7 = arith.addf %3, %6 : vector<1x4x1xf32>
    %c0_6 = arith.constant 0 : index
    %c0_7 = arith.constant 0 : index
    %c0_8 = arith.constant 0 : index
    %8 = vector.load %arg3[%c0_6, %c0_7, %c0_8] : memref<1x4x1xf32, #tpu.memory_space<vmem>>, vector<1x4x1xf32>
    tpu.vector_store %arg3[%c0_6, %c0_7, %c0_8], %7 {strides = array<i32>} : memref<1x4x1xf32, #tpu.memory_space<vmem>>, vector<1x4x1xf32>,
    %c0_i32_9 = arith.constant 0 : i32
    %9 = arith.cmpi eq, %arg1, %c0_i32_9 : i32
    %10 = arith.extui %9 : i1 to i32
    %c0_i32_10 = arith.constant 0 : i32
    %11 = arith.cmpi ne, %10, %c0_i32_10 : i32
    scf.if %11 {
      %c0_11 = arith.constant 0 : index
      %c0_12 = arith.constant 0 : index
      %c0_13 = arith.constant 0 : index
      %12 = vector.load %arg3[%c0_11, %c0_12, %c0_13] : memref<1x4x1xf32, #tpu.memory_space<vmem>>, vector<1x4x1xf32>
      %cst_14 = arith.constant 3.906250e-03 : f32
      %13 = vector.broadcast %cst_14 : f32 to vector<1x4x1xf32>
      %14 = arith.mulf %12, %13 : vector<1x4x1xf32>
      %c0_15 = arith.constant 0 : index
      %c0_16 = arith.constant 0 : index
      %c0_17 = arith.constant 0 : index
      %15 = vector.load %arg3[%c0_15, %c0_16, %c0_17] : memref<1x4x1xf32, #tpu.memory_space<vmem>>, vector<1x4x1xf32>
      tpu.vector_store %arg3[%c0_15, %c0_16, %c0_17], %14 {strides = array<i32>} : memref<1x4x1xf32, #tpu.memory_space<vmem>>, vector<1x4x1xf32>,
    } else {
    }
    return
  }
  func.func @transform_0(%arg0: i32, %arg1: i32) -> (i32, i32, i32) {
    %c0_i32 = arith.constant 0 : i32
    %c0_i32_0 = arith.constant 0 : i32
    return %arg0, %c0_i32, %arg1 : i32, i32, i32
  }
  func.func @transform_1(%arg0: i32, %arg1: i32) -> (i32, i32, i32) {
    %c0_i32 = arith.constant 0 : i32
    %c0_i32_0 = arith.constant 0 : i32
    %c0_i32_1 = arith.constant 0 : i32
    return %arg0, %c0_i32, %c0_i32_0 : i32, i32, i32
  }
}

</mosaic_0001>

<bundles_post_ra>
// kernel: tpu_custom_call.1
= control target key start
LH: loop header
LB: loop body
LE: loop exit
PB: predicated region body
PF: predicated region fallthrough
CT: control target
= control target key end

     0   :  { %6 = vsyncpa [#allocation3], 0  ;;  %s517_s0 = inlined_call_operand.hbm [shape: f32[2,4,256], index: 0, kind: input, shape index: {}]   ;;  %s518_s1 = inlined_call_operand.vmem [shape: f32[2,4,1], index: 1, kind: output, shape index: {}]  }
   0x1   :  { %8 = vsyncpa [#allocation3 + $0x1], 0  ;;  %s414_s6 = smov 0   ;;  %s416_s7 = smov 0  }
   0x2   :  { %s418_s8 = smov 0   ;;  %s420_s9 = smov 0  }
   0x3   :  { %s422_s10 = smov 0   ;;  %s424_s11 = smov 0  }
   0x4 LB: > { %s252_s12 = sadd.s32 4294967295, %s400_s11   ;;  %s26_s13 = sadd.s32 1, %s396_s10  ;;  %s400_s11 = sphi %s424_s11, %s14_s11   ;;  %s396_s10 = sphi %s422_s10, %s526_s10   ;;  %s392_s9 = sphi %s420_s9, %s525_s9   ;;  %s388_s8 = sphi %s418_s8, %s524_s8   ;;  %s384_s7 = sphi %s416_s7, %s523_s7   ;;  %s380_s6 = sphi %s414_s6, %s522_s6  }
   0x5   : > { %p28_p0 = scmp.ge.s32.totalorder %s26_s13, 2  ;;  %s35_s14 = sadd.s32 1, %s388_s8 }
   0x6   : > { %p42_p1 = scmp.ne.s32.totalorder %s388_s8, %s384_s7  ;;  %p43_p2 = scmp.eq.s32.totalorder %s400_s11, 0 }
   0x7   : > { %s528_s13 = smov (%p28_p0, %s26_s13), 0  ;;  %p48_p4 = scmp.ne.s32.totalorder %s384_s7, %s380_s6 }
   0x8   : > { %p450_p3 = por %p43_p2, %p42_p1  ;;  %s30_s16 = ssub.s32 %s396_s10, %s528_s13 }
   0x9   : > { %p49_p5 = scmp.eq.s32.totalorder %s252_s12, 0  ;;  %p33_p6 = scmp.eq.s32.totalorder %s30_s16, 0 }
   0xa   : > { %p271_p8 = scmp.lt.s32.totalorder %s400_s11, 2  ;;  %s98_s19 = sand.u32 1, %s388_s8  }
   0xb   : > { %p457_p7 = por %p49_p5, %p48_p4  ;;  %s264_s20 = sshll.u32 %s396_s10, 7 }
   0xc   : > { %s463_s18 = scalar_select %p33_p6, %s388_s8, %s35_s14  }
   0xd   : > { %s256_s21 = sshll.u32 %s98_s19, 3  ;;  %s110_s24 = scalar_lea.hbm %s517_s0, %s264_s20 }
   0xe   : > { %s102_s25 = scalar_lea.vmem [#allocation2], %s256_s21  ;;  %p472_p9 = pnand %p271_p8, %p450_p3 }
   0xf   : > { %s112_s26 = sshll.u32 %s102_s25, 4  ;;  %p259_p10 = scmp.ge.s32.totalorder %s400_s11, 1  ;;  %s113_s26 = int_to_ptr.vmem [resolvable:$true] %s112_s26 }
  0x10   : > { %p117_p11 = scmp.lt.s32.totalorder %s400_s11, 3  ;;  %s99_s28 = scalar_lea.sflag [#allocation3], %s98_s19 }
  0x11   : > { %p324_p12 = pneg %p472_p9  ;;  %s335_s29 = scalar_lea.vmem %s113_s26, 128 }
  0x12   : > { %p336_p13 = scmp.ne.s32.totalorder %s113_s26, %s335_s29  ;;  %s402_s30 = smov [#allocation2]  }
  0x13   : > { %s340_s2 = sshll.u32 %s402_s30, 4  ;;  %s341_s2 = int_to_ptr.vmem [resolvable:$false] %s340_s2 }
  0x14   : > { %p338_p0 = pnand %p336_p13, %p324_p12  ;;  %s342_s3 = scalar_lea.vmem %s341_s2, 256 }
  0x15   : > { %p343_p2 = scmp.lt.s32.totalorder %s113_s26, %s341_s2  ;;  %p344_p3 = scmp.lt.s32.totalorder %s342_s3, %s335_s29 }
  0x16   : > { %p339_p1 = pneg %p338_p0 }
  0x17   : > { %p345_p4 = por %p344_p3, %p343_p2 }
  0x19   : > { %p346_p5 = pnand %p345_p4, %p339_p1 }
  0x1b   : > { %349 = shalt.err (!%p346_p5)
}
  0x1c   : > { %270 = dma.hbm_to_vmem [thread:$0]  (!%p472_p9), %s110_s24, 128, %s113_s26, %s99_s28  }
  0x1d   : > { %p118_p6 = pnand %p259_p10, %p117_p11 }
  0x1e   : > { %s123_s4 = sand.u32 (!%p118_p6), 1, %s384_s7  }
  0x1f   : > { %121 = sbr.rel (%p118_p6) target bundleno = 194 (0xc2), region = 24  ;;  %s260_s5 = sshll.u32 (!%p118_p6), %s123_s4, 3 }
  0x20   : > { %s124_s6 = scalar_lea.sflag (!%p118_p6), [#allocation3], %s123_s4  ;;  %s127_s12 = scalar_lea.vmem (!%p118_p6), [#allocation2], %s260_s5 }
  0x24   : > { %375 = dma.done.wait (%p457_p7), %s124_s6, 128  }
  0x25   : > { %377 = vsyncadd (%p457_p7), %s124_s6, 4294967168  ;;  %p146_p8 = scmp.lt.s32.totalorder %s392_s9, 1  ;;  %vm154_vm0 = vcmask 3072   ;;  %vm161_vm1 = vcmask 1043456   ;;  %v403_v0 = vmov 0.0   ;;  %v157_v1 = vld [vmem:[%s127_s12] sm:$0xff] }
  0x26   : > { %v159_v2 = vcombine.high %v157_v1, %v157_v1  ;;  %v162_v3 = vsel %vm161_vm1, %v157_v1, 0.0 }
  0x27   : > { %s530_s9 = smov (!%p146_p8, %s392_s9), 1 }
  0x28   : > { %s261_s14 = sshll.u32 %s530_s9, 2  ;;  %v163_v4 = vsel %vm161_vm1, %v159_v2, 0.0 }
  0x29   : > { %s149_s19 = scalar_lea.vmem %s518_s1, %s261_s14  ;;  %v164_v5 = vadd.f32 %v163_v4, %v162_v3 }
  0x2a   : > { %155 = vst.msk [vmem:[%s149_s19] sm:$0xf] %vm154_vm0, %v403_v0 }
  0x2b   : > { %165 = vadd.xlane.f32.xlu0 %v164_v5 }
  0x31   : > { %v156_v6 = vld [vmem:[%s149_s19] sm:$0xf] }
  0xb4   : > { %v166_v7 = vpop.xlane.xlu0 %165 }
  0xb5   : > { %v167_v8 = vadd.f32 %v166_v7, %v156_v6 }
  0xb7   : > { %169 = vst.msk [vmem:[%s149_s19] sm:$0xf] %vm154_vm0, %v167_v8 }
  0xbe   : > { %v173_v9 = vld [vmem:[%s149_s19] sm:$0xf] }
  0xbf   : > { %v174_v10 = vmul.f32 0.00390625, %v173_v9 }
  0xc1   : > { %175 = vst.msk [vmem:[%s149_s19] sm:$0xf] %vm154_vm0, %v174_v10 }
  0xc2 PF: > { %s14_s11 = sadd.s32 1, %s400_s11   ;;  %s522_s6 = smov %s384_s7 }
  0xc3   : > { %p11_p7 = scmp.ge.s32.totalorder %s14_s11, 4   ;;  %s523_s7 = smov %s388_s8 }
  0xc4   : > { %s524_s8 = smov %s463_s18  ;;  %s525_s9 = smov %s396_s10 }
  0xc5   : > { %s526_s10 = smov %s528_s13  ;;  %13 = sbr.rel (!%p11_p7) target bundleno = 4 (0x4), region = 72 }
  0xca   :  { %195 = vsyncpa [#allocation3], 1 }
  0xcb   :  { %197 = vsyncpa [#allocation3 + $0x1], 1 }

</bundles_post_ra>
